<compile_context>
chip_gen: v5e
topology: v5e:2x2
jax: 0.10.0
libtpu: 0.0.40
codegen_flags: <defaults>
</compile_context>

<pallas_src>
import jax
import jax.numpy as jnp
from jax.experimental import pallas as pl
from jax.experimental.pallas import tpu as pltpu


# ---------------------------------------------------------------------------
# Kernel (closure over the static number of actions)
# ---------------------------------------------------------------------------
def make_acmodel_kernel(n_actions):
    def kernel(x_ref, w1_ref, b1_ref, w2_ref, b2_ref, w3_ref, b3_ref,
               logp_ref, value_ref):
        cdt = w1_ref.dtype                       # MXU operand dtype (f32 or bf16)

        # ---- fused layer 1: (B, obs) @ (obs, 2H) ----
        h = jnp.dot(x_ref[...].astype(cdt), w1_ref[...],
                    preferred_element_type=jnp.float32)
        h = jnp.maximum(h + b1_ref[...].astype(jnp.float32), 0.0)

        # ---- fused layer 2: block-diagonal (2H, 2H) == (128, 128) ----
        h = jnp.dot(h.astype(cdt), w2_ref[...],
                    preferred_element_type=jnp.float32)
        h = jnp.maximum(h + b2_ref[...].astype(jnp.float32), 0.0)

        # ---- fused layer 3: logits in lanes [0, A), value in lane A ----
        y = jnp.dot(h.astype(cdt), w3_ref[...],
                    preferred_element_type=jnp.float32)
        y = y + b3_ref[...].astype(jnp.float32)

        # ---- masked lane-dense log_softmax over the action lanes ----
        lane = jax.lax.broadcasted_iota(jnp.int32, y.shape, dimension=1)
        act = lane < n_actions
        neg = jnp.float32(-1e30)                 # finite: no inf arithmetic
        logits = jnp.where(act, y, neg)
        m = jnp.max(logits, axis=1, keepdims=True)
        shifted = logits - m                     # padded lanes stay ~-1e30
        ssum = jnp.sum(jnp.exp(shifted), axis=1, keepdims=True)
        logp = shifted - jnp.log(ssum)

        # ---- slim outputs: only the meaningful lanes hit HBM ----
        logp_ref[...] = logp[:, :n_actions]
        value_ref[...] = y[:, n_actions:n_actions + 1]
    return kernel


# ---------------------------------------------------------------------------
# Wrapper
# ---------------------------------------------------------------------------
def _choose_tile(B, cap=2048):
    """Largest multiple-of-8 divisor of B with >= 2 grid steps and <= cap."""
    limit = min(cap, B // 2)
    for cand in range(limit, 7, -1):
        if B % cand == 0 and cand % 8 == 0:
            return cand
    return None


def _cost_estimate(B, obs_dim, h2, lanes, n_actions, weight_bytes):
    flops = 2 * B * (obs_dim * h2 + h2 * h2 + h2 * lanes)
    transcendentals = B * (lanes + 1)            # exp per lane + log
    bytes_accessed = (B * (obs_dim * 4 + (n_actions + 1) * 4) + weight_bytes)
    return pl.CostEstimate(flops=flops,
                           transcendentals=transcendentals,
                           bytes_accessed=bytes_accessed)


def acmodel_forward(x, packed, n_actions, *, block_cap=2048, latency_b=64):
    """x: (B, obs_dim) f32.  packed = (W1,b1,W2,b2,W3,b3) fused params.

    Returns (log_probs (B, A) f32, value (B,) f32)."""
    B, obs_dim = x.shape
    W1, b1, W2, b2, W3, b3 = packed
    h2 = W1.shape[1]
    lanes = W3.shape[1]
    kernel = make_acmodel_kernel(n_actions)
    args = (x, W1, b1, W2, b2, W3, b3)
    out_shape = (jax.ShapeDtypeStruct((B, n_actions), jnp.float32),
                 jax.ShapeDtypeStruct((B, 1), jnp.float32))
    weight_bytes = sum(int(a.size) * a.dtype.itemsize
                       for a in (W1, b1, W2, b2, W3, b3))
    cost = _cost_estimate(B, obs_dim, h2, lanes, n_actions, weight_bytes)

    tb = _choose_tile(B, cap=block_cap) if B > latency_b else None

    if tb is None:
        # Tiny batch (or awkward B): single invocation, everything VMEM
        # resident, no pipeline bookkeeping -- pure latency path.
        vmem = pl.BlockSpec(memory_space=pltpu.MemorySpace.VMEM)
        logp, value = pl.pallas_call(
            kernel,
            out_shape=out_shape,
            in_specs=[vmem] * len(args),
            out_specs=(vmem, vmem),
            cost_estimate=cost,
        )(*args)
    else:
        # Large batch: tile B over a "parallel" grid (>= 2 steps so v7x's two
        # TensorCores both get work); weights/biases stay VMEM-resident.
        def resident(shape):
            return pl.BlockSpec(shape, lambda i: (0,) * len(shape))

        logp, value = pl.pallas_call(
            kernel,
            grid=(B // tb,),
            in_specs=[
                pl.BlockSpec((tb, obs_dim), lambda i: (i, 0)),
                resident(W1.shape), resident(b1.shape),
                resident(W2.shape), resident(b2.shape),
                resident(W3.shape), resident(b3.shape),
            ],
            out_specs=(pl.BlockSpec((tb, n_actions), lambda i: (i, 0)),
                       pl.BlockSpec((tb, 1), lambda i: (i, 0))),
            out_shape=out_shape,
            compiler_params=pltpu.CompilerParams(
                dimension_semantics=("parallel",)),
            cost_estimate=cost,
        )(*args)

    return logp, value.reshape(B)


# ---------------------------------------------------------------------------
# Parameter init (mirrors init_params: row-normalized N(0,1) weights, zero
# biases, PyTorch (out, in) layout) and packing into the fused layout.
# ---------------------------------------------------------------------------
def _torch_linear_init(key, in_dim, out_dim):
    w = jax.random.normal(key, (out_dim, in_dim), dtype=jnp.float32)
    w = w / jnp.sqrt(jnp.sum(w * w, axis=1, keepdims=True))
    b = jnp.zeros((out_dim,), dtype=jnp.float32)
    return w, b


def init_acmodel_params(key, obs_dim, hidden, n_actions):
    ks = jax.random.split(key, 6)
    return dict(
        a1=_torch_linear_init(ks[0], obs_dim, hidden),
        a2=_torch_linear_init(ks[1], hidden, hidden),
        a3=_torch_linear_init(ks[2], hidden, n_actions),
        c1=_torch_linear_init(ks[3], obs_dim, hidden),
        c2=_torch_linear_init(ks[4], hidden, hidden),
        c3=_torch_linear_init(ks[5], hidden, 1),
    )


def pack_params(raw, n_actions, weight_dtype=jnp.float32):
    """Pack per-layer (out,in) weights into fused lane-dense kernel weights.

    weight_dtype=bf16 is valid on all generations (v5e/v6e/v7x MXUs are
    bf16-native); it halves weight DMA.  Biases stay f32.  Keep f32 weights
    for the tiny-batch latency path if input precision matters."""
    (aw1, ab1), (aw2, ab2), (aw3, ab3) = raw["a1"], raw["a2"], raw["a3"]
    (cw1, cb1), (cw2, cb2), (cw3, cb3) = raw["c1"], raw["c2"], raw["c3"]
    hidden = aw1.shape[0]
    h2 = 2 * hidden
    lanes = max(128, ((n_actions + 1 + 127) // 128) * 128)

    # layer 1: concat actor|critic along output lanes
    W1 = jnp.concatenate([aw1.T, cw1.T], axis=1)                 # (obs, 2H)
    b1 = jnp.concatenate([ab1, cb1])[None, :]                    # (1, 2H)
    # layer 2: block-diagonal (2H, 2H) -- zero blocks are intentional
    W2 = jnp.zeros((h2, h2), jnp.float32)
    W2 = W2.at[:hidden, :hidden].set(aw2.T).at[hidden:, hidden:].set(cw2.T)
    b2 = jnp.concatenate([ab2, cb2])[None, :]
    # layer 3: logits in lanes [0, A), value in lane A, zero-padded to `lanes`
    W3 = jnp.zeros((h2, lanes), jnp.float32)
    W3 = W3.at[:hidden, :n_actions].set(aw3.T)
    W3 = W3.at[hidden:, n_actions:n_actions + 1].set(cw3.T)
    b3 = jnp.zeros((1, lanes), jnp.float32)
    b3 = b3.at[0, :n_actions].set(ab3).at[0, n_actions].set(cb3[0])

    W1, W2, W3 = (w.astype(weight_dtype) for w in (W1, W2, W3))
    return (W1, b1, W2, b2, W3, b3)


# ---------------------------------------------------------------------------
# References
# ---------------------------------------------------------------------------
def acmodel_reference(x, raw):
    """Unfused f32 reference with the original PyTorch per-layer semantics."""
    def lin(v, wb):
        w, b = wb
        return v @ w.T + b
    h = jnp.maximum(lin(x, raw["a1"]), 0.0)
    h = jnp.maximum(lin(h, raw["a2"]), 0.0)
    logp = jax.nn.log_softmax(lin(h, raw["a3"]), axis=1)
    g = jnp.maximum(lin(x, raw["c1"]), 0.0)
    g = jnp.maximum(lin(g, raw["c2"]), 0.0)
    value = lin(g, raw["c3"])[:, 0]
    return logp, value


def fused_reference(x, packed, n_actions):
    """Dtype-matched reference for the fused/bf16 path."""
    W1, b1, W2, b2, W3, b3 = packed
    cdt = W1.dtype
    h = jnp.maximum(jnp.dot(x.astype(cdt), W1,
                            preferred_element_type=jnp.float32) + b1, 0.0)
    h = jnp.maximum(jnp.dot(h.astype(cdt), W2,
                            preferred_element_type=jnp.float32) + b2, 0.0)
    y = jnp.dot(h.astype(cdt), W3, preferred_element_type=jnp.float32) + b3
    return jax.nn.log_softmax(y[:, :n_actions], axis=1), y[:, n_actions]


if __name__ == "__main__":
    # obs_dim = obs_space['image'][0]; hidden = ac_hidden_dim_size; A = action_space.n
    B, OBS_DIM, HIDDEN, N_ACTIONS = 8, 32, 64, 8

    key = jax.random.PRNGKey(0)
    k_param, k_obs, k_obs_big = jax.random.split(key, 3)

    raw = init_acmodel_params(k_param, OBS_DIM, HIDDEN, N_ACTIONS)

    # obs.image -> reshape(B, -1) happens in plain JAX glue; kernel sees (B, obs_dim)
    obs_image = jax.random.normal(k_obs, (B, OBS_DIM), dtype=jnp.float32)
    x = obs_image.reshape(B, -1)

    # ---- 1) f32 path (exact module semantics), tiny batch, no grid ----
    packed_f32 = pack_params(raw, N_ACTIONS, weight_dtype=jnp.float32)
    logp, value = acmodel_forward(x, packed_f32, N_ACTIONS)
    jax.block_until_ready((logp, value))
    ref_logp, ref_value = acmodel_reference(x, raw)
    assert logp.shape == (B, N_ACTIONS) and value.shape == (B,)
    assert jnp.allclose(logp, ref_logp, atol=1e-4), "f32 log_softmax mismatch"
    assert jnp.allclose(value, ref_value, atol=1e-4), "f32 value mismatch"

    # ---- 2) bf16 MXU operands (valid on v5e/v6e/v7x), dtype-matched ref ----
    packed_bf16 = pack_params(raw, N_ACTIONS, weight_dtype=jnp.bfloat16)
    logp_b, value_b = acmodel_forward(x, packed_bf16, N_ACTIONS)
    jax.block_until_ready((logp_b, value_b))
    rlogp_b, rvalue_b = fused_reference(x, packed_bf16, N_ACTIONS)
    assert jnp.allclose(logp_b, rlogp_b, atol=5e-2), "bf16 log_softmax mismatch"
    assert jnp.allclose(value_b, rvalue_b, atol=5e-2), "bf16 value mismatch"

    # ---- 3) large batch: tiled "parallel" grid (>=2 steps), resident weights ----
    BIG_B = 2048
    x_big = jax.random.normal(k_obs_big, (BIG_B, OBS_DIM), dtype=jnp.float32)
    logp2, value2 = acmodel_forward(x_big, packed_f32, N_ACTIONS)
    jax.block_until_ready((logp2, value2))
    ref_logp2, ref_value2 = acmodel_reference(x_big, raw)
    assert jnp.allclose(logp2, ref_logp2, atol=1e-4), "tiled log_softmax mismatch"
    assert jnp.allclose(value2, ref_value2, atol=1e-4), "tiled value mismatch"

    # TODO(synk): torch.distributions.Categorical (the dist object / sampling)
    # has no Pallas equivalent; the kernel returns the distribution's
    # log-prob logits plus the critic value instead.
    print("KERNEL_OK")
</pallas_src>

<mosaic_0001>
module attributes {stable_mosaic.version = 11 : i64} {
  func.func @kernel(%arg0: memref<8x32xf32, #tpu.memory_space<vmem>>, %arg1: memref<32x128xf32, #tpu.memory_space<vmem>>, %arg2: memref<1x128xf32, #tpu.memory_space<vmem>>, %arg3: memref<128x128xf32, #tpu.memory_space<vmem>>, %arg4: memref<1x128xf32, #tpu.memory_space<vmem>>, %arg5: memref<128x128xf32, #tpu.memory_space<vmem>>, %arg6: memref<1x128xf32, #tpu.memory_space<vmem>>, %arg7: memref<8x8xf32, #tpu.memory_space<vmem>>, %arg8: memref<8x1xf32, #tpu.memory_space<vmem>>) attributes {dimension_semantics = [], scalar_prefetch = 0 : i64, scratch_operands = 0 : i64, tpu.core_type = #tpu.core_type<tc>} {
    %c0 = arith.constant 0 : index
    %c0_0 = arith.constant 0 : index
    %0 = vector.load %arg0[%c0, %c0_0] : memref<8x32xf32, #tpu.memory_space<vmem>>, vector<8x32xf32>
    %c0_1 = arith.constant 0 : index
    %c0_2 = arith.constant 0 : index
    %1 = vector.load %arg1[%c0_1, %c0_2] : memref<32x128xf32, #tpu.memory_space<vmem>>, vector<32x128xf32>
    %cst = arith.constant dense<0.000000e+00> : vector<8x128xf32>
    %2 = tpu.matmul %0, %1, %cst {dimension_numbers = #tpu.dot_dimension_numbers<[1], [0], [0], [1], [0, 0, 1, 1], [], []>} : vector<8x32xf32>, vector<32x128xf32>, vector<8x128xf32> -> vector<8x128xf32>
    %c0_3 = arith.constant 0 : index
    %c0_4 = arith.constant 0 : index
    %3 = vector.load %arg2[%c0_3, %c0_4] : memref<1x128xf32, #tpu.memory_space<vmem>>, vector<1x128xf32>
    %4 = vector.broadcast %3 : vector<1x128xf32> to vector<8x128xf32>
    %5 = arith.addf %2, %4 : vector<8x128xf32>
    %cst_5 = arith.constant 0.000000e+00 : f32
    %6 = vector.broadcast %cst_5 : f32 to vector<8x128xf32>
    %7 = arith.maximumf %5, %6 : vector<8x128xf32>
    %c0_6 = arith.constant 0 : index
    %c0_7 = arith.constant 0 : index
    %8 = vector.load %arg3[%c0_6, %c0_7] : memref<128x128xf32, #tpu.memory_space<vmem>>, vector<128x128xf32>
    %cst_8 = arith.constant dense<0.000000e+00> : vector<8x128xf32>
    %9 = tpu.matmul %7, %8, %cst_8 {dimension_numbers = #tpu.dot_dimension_numbers<[1], [0], [0], [1], [0, 0, 1, 1], [], []>} : vector<8x128xf32>, vector<128x128xf32>, vector<8x128xf32> -> vector<8x128xf32>
    %c0_9 = arith.constant 0 : index
    %c0_10 = arith.constant 0 : index
    %10 = vector.load %arg4[%c0_9, %c0_10] : memref<1x128xf32, #tpu.memory_space<vmem>>, vector<1x128xf32>
    %11 = vector.broadcast %10 : vector<1x128xf32> to vector<8x128xf32>
    %12 = arith.addf %9, %11 : vector<8x128xf32>
    %cst_11 = arith.constant 0.000000e+00 : f32
    %13 = vector.broadcast %cst_11 : f32 to vector<8x128xf32>
    %14 = arith.maximumf %12, %13 : vector<8x128xf32>
    %c0_12 = arith.constant 0 : index
    %c0_13 = arith.constant 0 : index
    %15 = vector.load %arg5[%c0_12, %c0_13] : memref<128x128xf32, #tpu.memory_space<vmem>>, vector<128x128xf32>
    %cst_14 = arith.constant dense<0.000000e+00> : vector<8x128xf32>
    %16 = tpu.matmul %14, %15, %cst_14 {dimension_numbers = #tpu.dot_dimension_numbers<[1], [0], [0], [1], [0, 0, 1, 1], [], []>} : vector<8x128xf32>, vector<128x128xf32>, vector<8x128xf32> -> vector<8x128xf32>
    %c0_15 = arith.constant 0 : index
    %c0_16 = arith.constant 0 : index
    %17 = vector.load %arg6[%c0_15, %c0_16] : memref<1x128xf32, #tpu.memory_space<vmem>>, vector<1x128xf32>
    %18 = vector.broadcast %17 : vector<1x128xf32> to vector<8x128xf32>
    %19 = arith.addf %16, %18 : vector<8x128xf32>
    %20 = tpu.iota {dimensions = array<i32: 1>} : vector<8x128xi32>
    %c8_i32 = arith.constant 8 : i32
    %21 = vector.broadcast %c8_i32 : i32 to vector<8x128xi32>
    %22 = arith.cmpi slt, %20, %21 : vector<8x128xi32>
    %cst_17 = arith.constant -1.000000e+30 : f32
    %23 = vector.broadcast %cst_17 : f32 to vector<8x128xf32>
    %24 = arith.select %22, %19, %23 : vector<8x128xi1>, vector<8x128xf32>
    %cst_18 = arith.constant dense<0xFF800000> : vector<8xf32>
    %25 = vector.multi_reduction <maximumf>, %24, %cst_18 [1] : vector<8x128xf32> to vector<8xf32>
    %26 = vector.shape_cast %25 : vector<8xf32> to vector<8x1xf32>
    %27 = vector.broadcast %26 : vector<8x1xf32> to vector<8x128xf32>
    %28 = arith.subf %24, %27 : vector<8x128xf32>
    %29 = math.exp %28 : vector<8x128xf32>
    %cst_19 = arith.constant dense<0.000000e+00> : vector<8xf32>
    %30 = vector.multi_reduction <add>, %29, %cst_19 [1] : vector<8x128xf32> to vector<8xf32>
    %31 = vector.shape_cast %30 : vector<8xf32> to vector<8x1xf32>
    %32 = math.log %31 : vector<8x1xf32>
    %33 = vector.broadcast %32 : vector<8x1xf32> to vector<8x128xf32>
    %34 = arith.subf %28, %33 : vector<8x128xf32>
    %35 = vector.extract_strided_slice %34 {offsets = [0, 0], sizes = [8, 8], strides = [1, 1]} : vector<8x128xf32> to vector<8x8xf32>
    %c0_20 = arith.constant 0 : index
    %c0_21 = arith.constant 0 : index
    %36 = vector.load %arg7[%c0_20, %c0_21] : memref<8x8xf32, #tpu.memory_space<vmem>>, vector<8x8xf32>
    tpu.vector_store %arg7[%c0_20, %c0_21], %35 {strides = array<i32>} : memref<8x8xf32, #tpu.memory_space<vmem>>, vector<8x8xf32>,
    %37 = vector.extract_strided_slice %19 {offsets = [0, 8], sizes = [8, 1], strides = [1, 1]} : vector<8x128xf32> to vector<8x1xf32>
    %c0_22 = arith.constant 0 : index
    %c0_23 = arith.constant 0 : index
    %38 = vector.load %arg8[%c0_22, %c0_23] : memref<8x1xf32, #tpu.memory_space<vmem>>, vector<8x1xf32>
    tpu.vector_store %arg8[%c0_22, %c0_23], %37 {strides = array<i32>} : memref<8x1xf32, #tpu.memory_space<vmem>>, vector<8x1xf32>,
    return
  }
}

</mosaic_0001>

<bundles_post_ra>
// kernel: tpu_custom_call.1
= control target key start
LH: loop header
LB: loop body
LE: loop exit
PB: predicated region body
PF: predicated region fallthrough
CT: control target
= control target key end

     0   :  { %14 = vsyncpa [#allocation3], 0  ;;  %s474_s0 = inlined_call_operand.hbm [shape: f32[8,32], index: 0, kind: input, shape index: {}]   ;;  %s475_s1 = inlined_call_operand.hbm [shape: f32[32,128], index: 1, kind: input, shape index: {}]   ;;  %s476_s2 = inlined_call_operand.vmem [shape: f32[1,128], index: 2, kind: input, shape index: {}]   ;;  %s477_s3 = inlined_call_operand.hbm [shape: f32[128,128], index: 3, kind: input, shape index: {}]   ;;  %s478_s4 = inlined_call_operand.vmem [shape: f32[1,128], index: 4, kind: input, shape index: {}]   ;;  %s479_s5 = inlined_call_operand.hbm [shape: f32[128,128], index: 5, kind: input, shape index: {}]   ;;  %s480_s6 = inlined_call_operand.vmem [shape: f32[1,128], index: 6, kind: input, shape index: {}]   ;;  %s481_s7 = inlined_call_operand.hbm [shape: f32[8,8], index: 7, kind: output, shape index: {0}]   ;;  %s482_s8 = inlined_call_operand.vmem [shape: f32[8,1], index: 8, kind: output, shape index: {1}]  }
   0x1   :  { %15 = vsyncpa [#allocation6], 0 }
   0x2   :  { %16 = vsyncpa [#allocation9], 0  ;;  %s33_s29 = sshll.u32 %s475_s1, 4  ;;  %s34_s29 = int_to_ptr.hbm [resolvable:$true] %s33_s29 }
   0x3   :  { %17 = vsyncpa [#allocation4], 0  ;;  %s394_s30 = smov [#allocation5]   ;;  %s23_s12 = sshll.u32 %s474_s0, 4  ;;  %s24_s12 = int_to_ptr.hbm [resolvable:$true] %s23_s12 }
   0x4   :  { %s35_s9 = sshll.u32 %s394_s30, 4  ;;  %s395_s13 = smov 128   ;;  %s36_s9 = int_to_ptr.vmem [resolvable:$true] %s35_s9 }
   0x5   :  { %s396_s14 = smov 8   ;;  %s397_s15 = smov [#allocation2]  }
   0x6   :  { %41 = dma.hbm_to_vmem [thread:$0]  %s34_s29, 512, %s36_s9, [#allocation6], %s395_s13, %s395_s13, %s396_s14  }
   0x7   :  { %s25_s16 = sshll.u32 %s397_s15, 4  ;;  %s48_s19 = sshll.u32 %s477_s3, 4  ;;  %s26_s16 = int_to_ptr.vmem [resolvable:$true] %s25_s16  ;;  %s49_s19 = int_to_ptr.hbm [resolvable:$true] %s48_s19 }
   0x8   :  { %28 = dma.hbm_to_vmem [thread:$0]  %s24_s12, 128, %s26_s16, [#allocation3]  }
   0x9   :  { %s63_s21 = sshll.u32 %s479_s5, 4  ;;  %s398_s22 = smov [#allocation7]   ;;  %s64_s21 = int_to_ptr.hbm [resolvable:$true] %s63_s21 }
   0xa   :  { %s50_s23 = sshll.u32 %s398_s22, 4  ;;  %s399_s0 = smov [#allocation8]   ;;  %s51_s23 = int_to_ptr.vmem [resolvable:$true] %s50_s23 }
   0xb   :  { %56 = dma.hbm_to_vmem [thread:$0]  %s49_s19, 2048, %s51_s23, [#allocation6], %s395_s13, %s395_s13, %s396_s14  }
   0xc   :  { %s65_s24 = sshll.u32 %s399_s0, 4  ;;  %s66_s24 = int_to_ptr.vmem [resolvable:$true] %s65_s24 }
   0xd   :  { %71 = dma.hbm_to_vmem [thread:$0]  %s64_s21, 2048, %s66_s24, [#allocation9], %s395_s13, %s395_s13, %s396_s14  }
   0xe   :  { %386 = dma.done.wait [#allocation3], 128  }
   0xf   :  { %387 = vsyncadd [#allocation3], 4294967168 }
  0x10   :  { %388 = dma.done.wait [#allocation6], 2560  }
  0x11   :  { %389 = vsyncadd [#allocation6], 4294964736 }
  0x12   :  { %390 = dma.done.wait [#allocation9], 2048  }
  0x13   :  { %391 = vsyncadd [#allocation9], 4294965248  ;;  %v94_v0 = vld [vmem:[#allocation5 + $0x18] sm:$0xff]  ;;  %v93_v1 = vld [vmem:[#allocation5 + $0x10] sm:$0xff]  ;;  %vm99_vm0 = vcmask 261120   ;;  %v205_v45 = vlaneseq  ;;  %s400_s28 = smov 120  }
  0x14   :  { %115 = vmatpush.msra.mxu0 %v94_v0  ;;  %v139_v2 = vld [vmem:[#allocation7 + $0x78] sm:$0xff]  ;;  %v92_v3 = vld [vmem:[#allocation5 + $0x8] sm:$0xff]  ;;  %v138_v4 = vld [vmem:[#allocation7 + $0x70] sm:$0xff]  ;;  %vm225_vm2 = vcmask 7168   ;;  %s234_s11 = sshll.u32 %s481_s7, 4  ;;  %vm219_vm3 = vcmask 64512   ;;  %s235_s11 = int_to_ptr.hbm [resolvable:$true] %s234_s11 }
  0x15   :  { %144 = vmatpush.msra.mxu1 %v139_v2  ;;  %v137_v5 = vld [vmem:[#allocation7 + $0x68] sm:$0xff]  ;;  %v91_v6 = vld [vmem:[#allocation5] sm:$0xff]  ;;  %v90_v7 = vld [vmem:[#allocation2] sm:$0xff]  ;;  %v206_v46 = vand.u32 127, %v205_v45 }
  0x16   :  { %116 = vmatpush.msra.mxu0 %v93_v1  ;;  %v136_v8 = vld [vmem:[#allocation7 + $0x60] sm:$0xff]  ;;  %v135_v9 = vld [vmem:[#allocation7 + $0x58] sm:$0xff]  ;;  %v134_v10 = vld [vmem:[#allocation7 + $0x50] sm:$0xff] }
  0x17   :  { %145 = vmatpush.msra.mxu1 %v138_v4  ;;  %v133_v11 = vld [vmem:[#allocation7 + $0x48] sm:$0xff]  ;;  %v132_v12 = vld [vmem:[#allocation7 + $0x40] sm:$0xff]  ;;  %v131_v13 = vld [vmem:[#allocation7 + $0x38] sm:$0xff]  ;;  %vm207_vm1 = vcmp.lt.s32.totalorder %v206_v46, 8 }
  0x18   :  { %117 = vmatpush.msra.mxu0 %v92_v3  ;;  %v130_v14 = vld [vmem:[#allocation7 + $0x30] sm:$0xff]  ;;  %v129_v15 = vld [vmem:[#allocation7 + $0x28] sm:$0xff]  ;;  %v128_v16 = vld [vmem:[#allocation7 + $0x20] sm:$0xff] }
  0x19   :  { %146 = vmatpush.msra.mxu1 %v137_v5  ;;  %v127_v17 = vld [vmem:[#allocation7 + $0x18] sm:$0xff]  ;;  %v126_v18 = vld [vmem:[#allocation7 + $0x10] sm:$0xff]  ;;  %v125_v19 = vld [vmem:[#allocation7 + $0x8] sm:$0xff] }
  0x1a   :  { %118 = vmatpush.msra.mxu0 %v91_v6  ;;  %v124_v20 = vld [vmem:[#allocation7] sm:$0xff]  ;;  %v180_v21 = vld [vmem:[#allocation8 + $0x78] sm:$0xff]  ;;  %v179_v22 = vld [vmem:[#allocation8 + $0x70] sm:$0xff] }
  0x1b   :  { %250 = vmatmul.msk.f32.vlgmr.msra.gmra.mxu0 %vm99_vm0, %v90_v7  ;;  %147 = vmatpush.msra.mxu1 %v136_v8  ;;  %v178_v23 = vld [vmem:[#allocation8 + $0x68] sm:$0xff]  ;;  %v177_v24 = vld [vmem:[#allocation8 + $0x60] sm:$0xff]  ;;  %v176_v25 = vld [vmem:[#allocation8 + $0x58] sm:$0xff] }
  0x1c   :  { %185 = vmatpush.msra.mxu2 %v180_v21  ;;  %v175_v26 = vld [vmem:[#allocation8 + $0x50] sm:$0xff]  ;;  %v174_v27 = vld [vmem:[#allocation8 + $0x48] sm:$0xff]  ;;  %v173_v28 = vld [vmem:[#allocation8 + $0x40] sm:$0xff] }
  0x1d   :  { %148 = vmatpush.msra.mxu1 %v135_v9  ;;  %v172_v29 = vld [vmem:[#allocation8 + $0x38] sm:$0xff]  ;;  %v171_v30 = vld [vmem:[#allocation8 + $0x30] sm:$0xff]  ;;  %v170_v31 = vld [vmem:[#allocation8 + $0x28] sm:$0xff] }
  0x1e   :  { %186 = vmatpush.msra.mxu2 %v179_v22  ;;  %v169_v32 = vld [vmem:[#allocation8 + $0x20] sm:$0xff]  ;;  %v168_v33 = vld [vmem:[#allocation8 + $0x18] sm:$0xff]  ;;  %v167_v38 = vld [vmem:[#allocation8 + $0x10] sm:$0xff] }
  0x1f   :  { %149 = vmatpush.msra.mxu1 %v134_v10  ;;  %v259_v34 = vld [vmem:[%s476_s2] ss:$0 sm:$0xff]  ;;  %v166_v39 = vld [vmem:[#allocation8 + $0x8] sm:$0xff]  ;;  %v165_v40 = vld [vmem:[#allocation8] sm:$0xff] }
  0x20   :  { %187 = vmatpush.msra.mxu2 %v178_v23  ;;  %v260_v41 = vld [vmem:[%s478_s4] ss:$0 sm:$0xff] }
  0x21   :  { %150 = vmatpush.msra.mxu1 %v133_v11  ;;  %v261_v47 = vld [vmem:[%s480_s6] ss:$0 sm:$0xff]  ;;  %s401_s6 = smov [#allocation10]  }
  0x22   :  { %188 = vmatpush.msra.mxu2 %v177_v24  ;;  %s232_s30 = sshll.u32 %s401_s6, 4  ;;  %s233_s30 = int_to_ptr.vmem [resolvable:$true] %s232_s30 }
  0x23   :  { %151 = vmatpush.msra.mxu1 %v132_v12 }
  0x24   :  { %189 = vmatpush.msra.mxu2 %v176_v25 }
  0x25   :  { %152 = vmatpush.msra.mxu1 %v131_v13 }
  0x26   :  { %190 = vmatpush.msra.mxu2 %v175_v26 }
  0x27   :  { %153 = vmatpush.msra.mxu1 %v130_v14 }
  0x28   :  { %191 = vmatpush.msra.mxu2 %v174_v27 }
  0x29   :  { %154 = vmatpush.msra.mxu1 %v129_v15 }
  0x2a   :  { %192 = vmatpush.msra.mxu2 %v173_v28 }
  0x2b   :  { %155 = vmatpush.msra.mxu1 %v128_v16 }
  0x2c   :  { %193 = vmatpush.msra.mxu2 %v172_v29 }
  0x2d   :  { %156 = vmatpush.msra.mxu1 %v127_v17 }
  0x2e   :  { %194 = vmatpush.msra.mxu2 %v171_v30 }
  0x2f   :  { %157 = vmatpush.msra.mxu1 %v126_v18 }
  0x30   :  { %195 = vmatpush.msra.mxu2 %v170_v31 }
  0x31   :  { %158 = vmatpush.msra.mxu1 %v125_v19 }
  0x32   :  { %196 = vmatpush.msra.mxu2 %v169_v32 }
  0x33   :  { %159 = vmatpush.msra.mxu1 %v124_v20 }
  0x34   :  { %197 = vmatpush.msra.mxu2 %v168_v33 }
  0x36   :  { %198 = vmatpush.msra.mxu2 %v167_v38 }
  0x38   :  { %199 = vmatpush.msra.mxu2 %v166_v39 }
  0x3a   :  { %200 = vmatpush.msra.mxu2 %v165_v40 }
  0x98   :  { %v120_v35 = vpop.f32.mrf.mxu0 }
  0x99   :  { %v121_v36 = vadd.f32 %v259_v34, %v120_v35 }
  0x9b   :  { %v123_v37 = vmax.f32 %v121_v36, 0.0 }
  0x9d   :  { %160 = vmatmul.f32.vlgmr.msra.gmra.mxu1 %v123_v37 }
 0x11a   :  { %v161_v42 = vpop.f32.mrf.mxu1 }
 0x11b   :  { %v162_v43 = vadd.f32 %v260_v41, %v161_v42 }
 0x11d   :  { %v164_v44 = vmax.f32 %v162_v43, 0.0 }
 0x11f   :  { %201 = vmatmul.f32.vlgmr.msra.gmra.mxu2 %v164_v44 }
 0x1a2   :  { %v202_v48 = vpop.f32.mrf.mxu2 }
 0x1a3   :  { %v203_v49 = vadd.f32 %v261_v47, %v202_v48 }
 0x1a5   :  { %222 = vrot.lane.b32.xlu1 %v203_v49, %s400_s28  ;;  %v208_v50 = vsel %vm207_vm1, %v203_v49, -1e+30 }
 0x1a6   :  { %209 = vmax.xlane.f32.xlu0 %v208_v50 }
 0x217   :  { %v223_v51 = vpop.permute.xlu1 %222 }
 0x218   :  { %226 = vst.msk [vmem:[%s482_s8] sm:$0xff] %vm225_vm2, %v223_v51 }
 0x219   :  { %v210_v52 = vpop.xlane.xlu0 %209 }
 0x21a   :  { %v211_v53 = vsub.f32 %v208_v50, %v210_v52 }
 0x21c   :  { %v212_v54 = vmul.f32 1.442695, %v211_v53 }
 0x21e   :  { %262 = vpow2.f32 %v212_v54 }
 0x224   :  { %v263_v55 = vpop.eup %262 }
 0x225   :  { %214 = vadd.xlane.f32.xlu0 %v263_v55 }
 0x298   :  { %v215_v56 = vpop.xlane.xlu0 %214 }
 0x299   :  { %264 = vlog2.f32 %v215_v56 }
 0x29f   :  { %v265_v57 = vpop.eup %264 }
 0x2a0   :  { %v217_v58 = vmul.f32 0.6931472, %v265_v57 }
 0x2a2   :  { %v218_v59 = vsub.f32 %v211_v53, %v217_v58 }
 0x2a4   :  { %220 = vst.msk [vmem:[#allocation10] sm:$0xff] %vm219_vm3, %v218_v59 }
 0x2a5   :  { %237 = dma.vmem_to_hbm [thread:$0]  %s233_s30, 128, %s235_s11, [#allocation4]  }
 0x2a6   :  { %392 = dma.done.wait [#allocation4], 128  }
 0x2a7   :  { %393 = vsyncadd [#allocation4], 4294967168 }
 0x2a8   :  { %246 = vsyncpa [#allocation3], 1 }
 0x2a9   :  { %247 = vsyncpa [#allocation6], 1 }
 0x2aa   :  { %248 = vsyncpa [#allocation9], 1 }
 0x2ab   :  { %249 = vsyncpa [#allocation4], 1 }

</bundles_post_ra>
